<compile_context>
chip_gen: v7x
topology: tpu7x:2x2x1
jax: 0.10.0
libtpu: 0.0.40
codegen_flags: <defaults>
</compile_context>

<pallas_src>
import jax
import jax.numpy as jnp
from jax import lax
from jax.experimental import pallas as pl
from jax.experimental.pallas import tpu as pltpu

LANE = 128  # lane-dense padded width for the hidden and class dims


def gcn_kernel(adj_ref, x_ref, w1_ref, b1_ref, w2_ref, b2_ref, out_ref):
    # adj_ref: (G, N, N) int8 counts of (A + I); row = target, col = source.
    adj_f32 = adj_ref[...].astype(jnp.float32)                   # VPU cast, hidden under DMA
    deg = jnp.sum(adj_f32, axis=-1, keepdims=True)               # (G, N, 1) exact integer sums
    d = jnp.where(deg > 0.0, lax.rsqrt(jnp.maximum(deg, 1e-12)), 0.0)
    adj = adj_f32.astype(jnp.bfloat16)                           # (G, N, N) bf16 MXU operand

    x = x_ref[...]                                               # (G, N, F) bf16

    # ---- layer 1: GCNConv(F_in -> 16), padded to LANE ----
    xw1 = jnp.einsum("gnf,fh->gnh", x, w1_ref[...],
                     preferred_element_type=jnp.float32)          # (G, N, LANE) f32
    xw1 = (xw1 * d).astype(jnp.bfloat16)                          # source-side D^{-1/2}
    agg1 = jnp.einsum("gij,gjh->gih", adj, xw1,
                      preferred_element_type=jnp.float32)         # (G, N, LANE) f32
    h1 = jnp.maximum(agg1 * d + b1_ref[...], 0.0)                 # target-side D^{-1/2}, bias, ReLU
    # F.dropout(training=False) -> identity (inference).

    # ---- layer 2: GCNConv(16 -> C), padded to LANE ----
    xw2 = jnp.einsum("gnh,hc->gnc", h1.astype(jnp.bfloat16), w2_ref[...],
                     preferred_element_type=jnp.float32)
    xw2 = (xw2 * d).astype(jnp.bfloat16)
    agg2 = jnp.einsum("gij,gjc->gic", adj, xw2,
                      preferred_element_type=jnp.float32)
    h2 = agg2 * d + b2_ref[...]               # padded class columns get -1e30 via b2

    # ---- log_softmax over the class (lane) axis, f32 math; pad columns -> exp() == 0 ----
    m = jnp.max(h2, axis=-1, keepdims=True)
    z = h2 - m
    lse = jnp.log(jnp.sum(jnp.exp(z), axis=-1, keepdims=True))
    out_ref[...] = (z - lse).astype(out_ref.dtype)                # cast to bf16 only at the store


def gcn_forward(adj_i8, x_bf16, w1p, b1p, w2p, b2p, *, graphs_per_step=2):
    """adj_i8: (B,N,N) int8 counts of A+I; x_bf16: (B,N,F) bf16; params pre-padded/cast."""
    b, n, f = x_bf16.shape
    g = graphs_per_step
    assert b % g == 0, "batch must be divisible by graphs_per_step"
    # NOTE: raise pltpu.CompilerParams(vmem_limit_bytes=...) when increasing G or N
    # (v7x has half the VMEM of v5e/v6e); at these demo shapes the default is ample.
    return pl.pallas_call(
        gcn_kernel,
        out_shape=jax.ShapeDtypeStruct((b, n, LANE), jnp.bfloat16),
        grid_spec=pltpu.PrefetchScalarGridSpec(
            num_scalar_prefetch=0,
            grid=(b // g,),
            in_specs=[
                pl.BlockSpec((g, n, n), lambda i: (i, 0, 0)),      # adj (A+I) counts, int8
                pl.BlockSpec((g, n, f), lambda i: (i, 0, 0)),      # node features, bf16
                pl.BlockSpec((f, LANE), lambda i: (0, 0)),         # w1 (lane-padded, bf16)
                pl.BlockSpec((1, LANE), lambda i: (0, 0)),         # b1 (lane-padded, f32)
                pl.BlockSpec((LANE, LANE), lambda i: (0, 0)),      # w2 (lane-padded, bf16)
                pl.BlockSpec((1, LANE), lambda i: (0, 0)),         # b2 (-1e30 on pad cols, f32)
            ],
            out_specs=pl.BlockSpec((g, n, LANE), lambda i: (i, 0, 0)),
        ),
        compiler_params=pltpu.CompilerParams(
            dimension_semantics=("parallel",)),   # graph groups are independent; shards over v7x TCs
    )(adj_i8, x_bf16, w1p, b1p, w2p, b2p)


def prepare_params(w1, b1, w2, b2):
    """Pad hidden/class dims to LANE and cast matmul weights to bf16 (done once)."""
    f_in, hid = w1.shape
    _, c = w2.shape
    w1p = jnp.zeros((f_in, LANE), jnp.float32).at[:, :hid].set(w1).astype(jnp.bfloat16)
    b1p = jnp.zeros((1, LANE), jnp.float32).at[:, :hid].set(b1.reshape(1, hid))
    w2p = jnp.zeros((LANE, LANE), jnp.float32).at[:hid, :c].set(w2).astype(jnp.bfloat16)
    # Huge negative bias on padded class columns -> exp() underflows to 0 in log_softmax.
    b2p = jnp.full((1, LANE), -1e30, jnp.float32).at[:, :c].set(b2.reshape(1, c))
    return w1p, b1p, w2p, b2p


def build_graph_inputs(x, edge_index, num_nodes):
    """Dense (A + I) integer counts (target-row, source-col, scatter-ADD like PyG) as int8.

    Row-sum of (A+I) == PyG gcn_norm degree (scatter over the target/col index) plus the
    self-loop, so directed graphs normalize identically to the reference module.
    NOTE: assumes edge_index has no pre-existing self-loops (PyG's add_self_loops would
    otherwise guarantee exactly one) and multi-edge counts fit int8.
    """
    src, dst = edge_index
    adj = jnp.zeros((num_nodes, num_nodes), jnp.float32).at[dst, src].add(1.0)
    adj = adj + jnp.eye(num_nodes, dtype=jnp.float32)
    return adj.astype(jnp.int8), x.astype(jnp.bfloat16)


def ref_forward(adj_f32, x_f32, w1, b1, w2, b2):
    """Pure-JAX f32 reference of the exact module semantics (eval mode)."""
    deg = jnp.sum(adj_f32, axis=1, keepdims=True)
    d = jnp.where(deg > 0, lax.rsqrt(deg), 0.0)
    a_norm = d * adj_f32 * d.reshape(1, -1)
    h = jnp.maximum(a_norm @ (x_f32 @ w1) + b1, 0.0)
    h = a_norm @ (h @ w2) + b2
    return jax.nn.log_softmax(h, axis=1)


if __name__ == "__main__":
    key = jax.random.PRNGKey(0)
    B, N, F_IN, HID, C = 8, 32, 16, 16, 8
    G = 2                              # graphs per grid step -> grid = (4,), even for v7x TCs

    k_w1, k_w2, k_x0, k_e0 = jax.random.split(key, 4)

    def glorot(k, shape):
        limit = (6.0 / (shape[0] + shape[1])) ** 0.5
        return jax.random.uniform(k, shape, jnp.float32, -limit, limit)

    # GCNConv(F_IN, 16) and GCNConv(16, C) parameters (glorot weights, zero biases).
    w1 = glorot(k_w1, (F_IN, HID))
    b1 = jnp.zeros((1, HID), jnp.float32)
    w2 = glorot(k_w2, (HID, C))
    b2 = jnp.zeros((1, C), jnp.float32)
    w1p, b1p, w2p, b2p = prepare_params(w1, b1, w2, b2)   # pad/cast ONCE, outside hot path

    adjs_i8, xs_bf16, adjs_f32, xs_f32 = [], [], [], []
    for g in range(B):
        k_x = jax.random.fold_in(k_x0, g)
        k_e = jax.random.fold_in(k_e0, g)
        x = jax.random.normal(k_x, (N, F_IN), dtype=jnp.float32)
        # Deterministic edge_index (2, E): bidirectional ring + random bidirectional edges.
        ring_src = jnp.arange(N)
        ring_dst = (ring_src + 1) % N
        rand_src = jax.random.randint(k_e, (16,), 0, N)
        rand_dst = (rand_src + jax.random.randint(jax.random.fold_in(k_e, 1), (16,), 1, N)) % N
        src = jnp.concatenate([ring_src, ring_dst, rand_src, rand_dst])
        dst = jnp.concatenate([ring_dst, ring_src, rand_dst, rand_src])
        edge_index = jnp.stack([src, dst])

        adj_i8, x_bf16 = build_graph_inputs(x, edge_index, N)
        adjs_i8.append(adj_i8)
        xs_bf16.append(x_bf16)
        adjs_f32.append(adj_i8.astype(jnp.float32))
        xs_f32.append(x)

    adj_b = jnp.stack(adjs_i8)    # (B, N, N) int8
    x_b = jnp.stack(xs_bf16)      # (B, N, F_IN) bf16

    out_padded = gcn_forward(adj_b, x_b, w1p, b1p, w2p, b2p, graphs_per_step=G)
    out_padded = jax.block_until_ready(out_padded)
    out = out_padded[:, :, :C].astype(jnp.float32)    # drop lane padding, f32 for checks

    # Sanity 1: log_softmax rows sum to 1 in probability space over the real classes
    # (bf16 output rounding => slightly loose tolerance).
    assert out.shape == (B, N, C)
    assert bool(jnp.allclose(jnp.sum(jnp.exp(out), axis=-1), 1.0, atol=2e-2))

    # Sanity 2: matches the f32 pure-JAX reference within bf16-matmul/output tolerance.
    for g in range(B):
        ref = ref_forward(adjs_f32[g], xs_f32[g], w1, b1, w2, b2)
        assert bool(jnp.allclose(out[g], ref, atol=1e-1)), "mismatch vs f32 reference"

    print("KERNEL_OK")
</pallas_src>

<mosaic_0001>
module attributes {stable_mosaic.version = 11 : i64} {
  func.func @gcn_kernel(%arg0: i32, %arg1: memref<2x32x32xi8, #tpu.memory_space<vmem>>, %arg2: memref<2x32x16xbf16, #tpu.memory_space<vmem>>, %arg3: memref<16x128xbf16, #tpu.memory_space<vmem>>, %arg4: memref<1x128xf32, #tpu.memory_space<vmem>>, %arg5: memref<128x128xbf16, #tpu.memory_space<vmem>>, %arg6: memref<1x128xf32, #tpu.memory_space<vmem>>, %arg7: memref<2x32x128xbf16, #tpu.memory_space<vmem>>) attributes {dimension_semantics = [#tpu.dimension_semantics<parallel>], iteration_bounds = array<i64: 4>, scalar_prefetch = 0 : i64, scratch_operands = 0 : i64, tpu.core_type = #tpu.core_type<tc>, window_params = [{transform_indices = @transform_0, window_bounds = array<i64: 2, 32, 32>}, {transform_indices = @transform_1, window_bounds = array<i64: 2, 32, 16>}, {pipeline_mode = #tpu.pipeline_mode<synchronous>, transform_indices = @transform_2, window_bounds = array<i64: 16, 128>}, {pipeline_mode = #tpu.pipeline_mode<synchronous>, transform_indices = @transform_3, window_bounds = array<i64: 1, 128>}, {pipeline_mode = #tpu.pipeline_mode<synchronous>, transform_indices = @transform_4, window_bounds = array<i64: 128, 128>}, {pipeline_mode = #tpu.pipeline_mode<synchronous>, transform_indices = @transform_5, window_bounds = array<i64: 1, 128>}, {transform_indices = @transform_6, window_bounds = array<i64: 2, 32, 128>}]} {
    %c0 = arith.constant 0 : index
    %c0_0 = arith.constant 0 : index
    %c0_1 = arith.constant 0 : index
    %0 = vector.load %arg1[%c0, %c0_0, %c0_1] : memref<2x32x32xi8, #tpu.memory_space<vmem>>, vector<2x32x32xi8>
    %1 = arith.sitofp %0 : vector<2x32x32xi8> to vector<2x32x32xf32>
    %cst = arith.constant dense<0.000000e+00> : vector<2x32xf32>
    %2 = vector.multi_reduction <add>, %1, %cst [2] : vector<2x32x32xf32> to vector<2x32xf32>
    %3 = vector.shape_cast %2 : vector<2x32xf32> to vector<2x32x1xf32>
    %cst_2 = arith.constant 0.000000e+00 : f32
    %4 = vector.broadcast %cst_2 : f32 to vector<2x32x1xf32>
    %5 = arith.cmpf ogt, %3, %4 : vector<2x32x1xf32>
    %cst_3 = arith.constant 9.99999996E-13 : f32
    %6 = vector.broadcast %cst_3 : f32 to vector<2x32x1xf32>
    %7 = arith.maximumf %3, %6 : vector<2x32x1xf32>
    %8 = math.rsqrt %7 : vector<2x32x1xf32>
    %cst_4 = arith.constant 0.000000e+00 : f32
    %9 = vector.broadcast %cst_4 : f32 to vector<2x32x1xf32>
    %10 = arith.select %5, %8, %9 : vector<2x32x1xi1>, vector<2x32x1xf32>
    %11 = arith.truncf %1 : vector<2x32x32xf32> to vector<2x32x32xbf16>
    %c0_5 = arith.constant 0 : index
    %c0_6 = arith.constant 0 : index
    %c0_7 = arith.constant 0 : index
    %12 = vector.load %arg2[%c0_5, %c0_6, %c0_7] : memref<2x32x16xbf16, #tpu.memory_space<vmem>>, vector<2x32x16xbf16>
    %c0_8 = arith.constant 0 : index
    %c0_9 = arith.constant 0 : index
    %13 = vector.load %arg3[%c0_8, %c0_9] : memref<16x128xbf16, #tpu.memory_space<vmem>>, vector<16x128xbf16>
    "tpu.trace_start"() <{level = 10 : i32, message = "gnf,fh->gnh"}> : () -> ()
    %cst_10 = arith.constant dense<0.000000e+00> : vector<2x32x128xf32>
    %14 = tpu.matmul %12, %13, %cst_10 {dimension_numbers = #tpu.dot_dimension_numbers<[2], [0], [0, 1], [1], [0, 0, 0, 1, 1, 1], [], []>} : vector<2x32x16xbf16>, vector<16x128xbf16>, vector<2x32x128xf32> -> vector<2x32x128xf32>
    "tpu.trace_stop"() : () -> ()
    %15 = vector.broadcast %10 : vector<2x32x1xf32> to vector<2x32x128xf32>
    %16 = arith.mulf %14, %15 : vector<2x32x128xf32>
    %17 = arith.truncf %16 : vector<2x32x128xf32> to vector<2x32x128xbf16>
    "tpu.trace_start"() <{level = 10 : i32, message = "gij,gjh->gih"}> : () -> ()
    %cst_11 = arith.constant dense<0.000000e+00> : vector<2x32x128xf32>
    %18 = tpu.matmul %11, %17, %cst_11 {dimension_numbers = #tpu.dot_dimension_numbers<[2], [1], [1], [2], [0, 0, 0, 1, 1, 2], [0], [0]>} : vector<2x32x32xbf16>, vector<2x32x128xbf16>, vector<2x32x128xf32> -> vector<2x32x128xf32>
    "tpu.trace_stop"() : () -> ()
    %19 = vector.broadcast %10 : vector<2x32x1xf32> to vector<2x32x128xf32>
    %20 = arith.mulf %18, %19 : vector<2x32x128xf32>
    %c0_12 = arith.constant 0 : index
    %c0_13 = arith.constant 0 : index
    %21 = vector.load %arg4[%c0_12, %c0_13] : memref<1x128xf32, #tpu.memory_space<vmem>>, vector<1x128xf32>
    %22 = vector.shape_cast %21 : vector<1x128xf32> to vector<1x1x128xf32>
    %23 = vector.broadcast %22 : vector<1x1x128xf32> to vector<2x32x128xf32>
    %24 = arith.addf %20, %23 : vector<2x32x128xf32>
    %cst_14 = arith.constant 0.000000e+00 : f32
    %25 = vector.broadcast %cst_14 : f32 to vector<2x32x128xf32>
    %26 = arith.maximumf %24, %25 : vector<2x32x128xf32>
    %27 = arith.truncf %26 : vector<2x32x128xf32> to vector<2x32x128xbf16>
    %c0_15 = arith.constant 0 : index
    %c0_16 = arith.constant 0 : index
    %28 = vector.load %arg5[%c0_15, %c0_16] : memref<128x128xbf16, #tpu.memory_space<vmem>>, vector<128x128xbf16>
    "tpu.trace_start"() <{level = 10 : i32, message = "gnh,hc->gnc"}> : () -> ()
    %cst_17 = arith.constant dense<0.000000e+00> : vector<2x32x128xf32>
    %29 = tpu.matmul %27, %28, %cst_17 {dimension_numbers = #tpu.dot_dimension_numbers<[2], [0], [0, 1], [1], [0, 0, 0, 1, 1, 1], [], []>} : vector<2x32x128xbf16>, vector<128x128xbf16>, vector<2x32x128xf32> -> vector<2x32x128xf32>
    "tpu.trace_stop"() : () -> ()
    %30 = vector.broadcast %10 : vector<2x32x1xf32> to vector<2x32x128xf32>
    %31 = arith.mulf %29, %30 : vector<2x32x128xf32>
    %32 = arith.truncf %31 : vector<2x32x128xf32> to vector<2x32x128xbf16>
    "tpu.trace_start"() <{level = 10 : i32, message = "gij,gjc->gic"}> : () -> ()
    %cst_18 = arith.constant dense<0.000000e+00> : vector<2x32x128xf32>
    %33 = tpu.matmul %11, %32, %cst_18 {dimension_numbers = #tpu.dot_dimension_numbers<[2], [1], [1], [2], [0, 0, 0, 1, 1, 2], [0], [0]>} : vector<2x32x32xbf16>, vector<2x32x128xbf16>, vector<2x32x128xf32> -> vector<2x32x128xf32>
    "tpu.trace_stop"() : () -> ()
    %34 = vector.broadcast %10 : vector<2x32x1xf32> to vector<2x32x128xf32>
    %35 = arith.mulf %33, %34 : vector<2x32x128xf32>
    %c0_19 = arith.constant 0 : index
    %c0_20 = arith.constant 0 : index
    %36 = vector.load %arg6[%c0_19, %c0_20] : memref<1x128xf32, #tpu.memory_space<vmem>>, vector<1x128xf32>
    %37 = vector.shape_cast %36 : vector<1x128xf32> to vector<1x1x128xf32>
    %38 = vector.broadcast %37 : vector<1x1x128xf32> to vector<2x32x128xf32>
    %39 = arith.addf %35, %38 : vector<2x32x128xf32>
    %cst_21 = arith.constant dense<0xFF800000> : vector<2x32xf32>
    %40 = vector.multi_reduction <maximumf>, %39, %cst_21 [2] : vector<2x32x128xf32> to vector<2x32xf32>
    %41 = vector.shape_cast %40 : vector<2x32xf32> to vector<2x32x1xf32>
    %42 = vector.broadcast %41 : vector<2x32x1xf32> to vector<2x32x128xf32>
    %43 = arith.subf %39, %42 : vector<2x32x128xf32>
    %44 = math.exp %43 : vector<2x32x128xf32>
    %cst_22 = arith.constant dense<0.000000e+00> : vector<2x32xf32>
    %45 = vector.multi_reduction <add>, %44, %cst_22 [2] : vector<2x32x128xf32> to vector<2x32xf32>
    %46 = vector.shape_cast %45 : vector<2x32xf32> to vector<2x32x1xf32>
    %47 = math.log %46 : vector<2x32x1xf32>
    %48 = vector.broadcast %47 : vector<2x32x1xf32> to vector<2x32x128xf32>
    %49 = arith.subf %43, %48 : vector<2x32x128xf32>
    %50 = arith.truncf %49 : vector<2x32x128xf32> to vector<2x32x128xbf16>
    %c0_23 = arith.constant 0 : index
    %c0_24 = arith.constant 0 : index
    %c0_25 = arith.constant 0 : index
    %51 = vector.load %arg7[%c0_23, %c0_24, %c0_25] : memref<2x32x128xbf16, #tpu.memory_space<vmem>>, vector<2x32x128xbf16>
    tpu.vector_store %arg7[%c0_23, %c0_24, %c0_25], %50 {strides = array<i32>} : memref<2x32x128xbf16, #tpu.memory_space<vmem>>, vector<2x32x128xbf16>,
    return
  }
  func.func @transform_0(%arg0: i32) -> (i32, i32, i32) {
    %c0_i32 = arith.constant 0 : i32
    %c0_i32_0 = arith.constant 0 : i32
    %c0_i32_1 = arith.constant 0 : i32
    return %arg0, %c0_i32, %c0_i32_0 : i32, i32, i32
  }
  func.func @transform_1(%arg0: i32) -> (i32, i32, i32) {
    %c0_i32 = arith.constant 0 : i32
    %c0_i32_0 = arith.constant 0 : i32
    %c0_i32_1 = arith.constant 0 : i32
    return %arg0, %c0_i32, %c0_i32_0 : i32, i32, i32
  }
  func.func @transform_2(%arg0: i32) -> (i32, i32) {
    %c0_i32 = arith.constant 0 : i32
    %c0_i32_0 = arith.constant 0 : i32
    %c0_i32_1 = arith.constant 0 : i32
    return %c0_i32, %c0_i32_0 : i32, i32
  }
  func.func @transform_3(%arg0: i32) -> (i32, i32) {
    %c0_i32 = arith.constant 0 : i32
    %c0_i32_0 = arith.constant 0 : i32
    %c0_i32_1 = arith.constant 0 : i32
    return %c0_i32, %c0_i32_0 : i32, i32
  }
  func.func @transform_4(%arg0: i32) -> (i32, i32) {
    %c0_i32 = arith.constant 0 : i32
    %c0_i32_0 = arith.constant 0 : i32
    %c0_i32_1 = arith.constant 0 : i32
    return %c0_i32, %c0_i32_0 : i32, i32
  }
  func.func @transform_5(%arg0: i32) -> (i32, i32) {
    %c0_i32 = arith.constant 0 : i32
    %c0_i32_0 = arith.constant 0 : i32
    %c0_i32_1 = arith.constant 0 : i32
    return %c0_i32, %c0_i32_0 : i32, i32
  }
  func.func @transform_6(%arg0: i32) -> (i32, i32, i32) {
    %c0_i32 = arith.constant 0 : i32
    %c0_i32_0 = arith.constant 0 : i32
    %c0_i32_1 = arith.constant 0 : i32
    return %arg0, %c0_i32, %c0_i32_0 : i32, i32, i32
  }
}

</mosaic_0001>

<bundles_post_ra>
// kernel: tpu_custom_call.1
= control target key start
LH: loop header
LB: loop body
LE: loop exit
PB: predicated region body
PF: predicated region fallthrough
CT: control target
= control target key end

     0   :  { %11 = vsyncpa [#allocation3], 0  ;;  %s1762_s0 = inlined_call_operand.vmem [shape: s8[8,32,32], index: 0, kind: input, shape index: {}]   ;;  %s1763_s1 = inlined_call_operand.vmem [shape: bf16[8,32,16], index: 1, kind: input, shape index: {}]   ;;  %s1764_s2 = inlined_call_operand.vmem [shape: bf16[16,128], index: 2, kind: input, shape index: {}]   ;;  %s1765_s3 = inlined_call_operand.vmem [shape: f32[1,128], index: 3, kind: input, shape index: {}]   ;;  %s1766_s4 = inlined_call_operand.vmem [shape: bf16[128,128], index: 4, kind: input, shape index: {}]   ;;  %s1767_s5 = inlined_call_operand.vmem [shape: f32[1,128], index: 5, kind: input, shape index: {}]   ;;  %s1768_s6 = inlined_call_operand.hbm [shape: bf16[8,32,128], index: 6, kind: output, shape index: {}]  }
   0x1   :  { %13 = vsyncpa [#allocation3 + $0x1], 0  ;;  %s1488_s21 = smov 0   ;;  %s1490_s22 = smov 0  }
   0x2   :  { %s1492_s23 = smov 0   ;;  %s1494_s24 = smov 0  }
   0x3 LB: > { %s1509_s25 = sadd.s32 4294967295, %s1448_s24   ;;  %s1100_s26 = sadd.s32 4294967294, %s1448_s24   ;;  %s1448_s24 = sphi %s1494_s24, %s1774_s24   ;;  %s1444_s23 = sphi %s1492_s23, %s1773_s23   ;;  %s1440_s22 = sphi %s1490_s22, %s1772_s22   ;;  %s1436_s21 = sphi %s1488_s21, %s1771_s21  }
   0x4   : > { %s1513_s27 = sadd.s32 1, %s1448_s24   ;;  %s162_s28 = sadd.s32 1, %s1444_s23 }
   0x5   : > { %s159_s29 = ssub.s32 %s1448_s24, %s1513_s27  ;;  %p172_p0 = scmp.ne.s32.totalorder %s1444_s23, %s1440_s22 }
   0x6   : > { %p160_p1 = scmp.eq.s32.totalorder %s159_s29, 0  ;;  %p173_p2 = scmp.eq.s32.totalorder %s1509_s25, 3 }
   0x7   : > { %p178_p3 = scmp.ne.s32.totalorder %s1440_s22, %s1436_s21  ;;  %p179_p4 = scmp.eq.s32.totalorder %s1100_s26, 3 }
   0x8   : > { %s1524_s30 = scalar_select %p160_p1, %s1444_s23, %s162_s28  }
   0x9   : > { %p1526_p5 = por %p173_p2, %p172_p0  ;;  %p1530_p6 = por %p179_p4, %p178_p3 }
   0xa   : > { %p1103_p7 = scmp.ge.s32.totalorder %s1448_s24, 1  ;;  %p228_p8 = scmp.lt.s32.totalorder %s1448_s24, 5 }
   0xc   : > { %p229_p9 = pnand %p1103_p7, %p228_p8 }
   0xd   : > { %v1325_v0 = vld [vmem:[%s1764_s2] sm:$0xff] (!%p229_p9)   ;;  %s1105_s11 = sshll.u32 (!%p229_p9), %s1509_s25, 1  ;;  %vm394_vm0 = vcmask (!%p229_p9), 130048   ;;  %vm297_vm1 = vcmask (!%p229_p9), 261120   ;;  %v1331_v33 = vld [vmem:[%s1766_s4 + $0x8] sm:$0xff] (!%p229_p9)   ;;  %v1332_v34 = vld [vmem:[%s1766_s4 + $0x10] sm:$0xff] (!%p229_p9)  }
   0xe   : > { %232 = sbr.rel (%p229_p9) target bundleno = 1266 (0x4f2), region = 44  ;;  %p265_p10 = scmp.lt.s32.totalorder (!%p229_p9), %s1105_s11, 7  ;;  %1218 = vmatprep.subr.bf16.mxu0 (!%p229_p9), %v1325_v0  ;;  %v1330_v32 = vld [vmem:[%s1766_s4] sm:$0xff] (!%p229_p9)   ;;  %v1333_v35 = vld [vmem:[%s1766_s4 + $0x18] sm:$0xff] (!%p229_p9)  }
   0xf   : > { %1219 = vmatpush3.bf16.msra.mxu0 (!%p229_p9), %v1325_v0  ;;  %v1334_v36 = vld [vmem:[%s1766_s4 + $0x20] sm:$0xff] (!%p229_p9)   ;;  %s261_s10 = sand.u32 (!%p229_p9), 1, %s1440_s22  }
  0x10   : > { %1244 = vmatprep.subr.bf16.mxu0 (!%p229_p9), %v1330_v32 }
  0x15   : > { %s1776_s11 = smov (!%p265_p10, %s1105_s11), 7 }
  0x16   : > { %s1151_s12 = sshll.u32 %s1776_s11, 4  ;;  %s1106_s13 = sshll.u32 %s1776_s11, 3 }
  0x17   : > { %s275_s16 = scalar_lea.vmem %s1763_s1, %s1151_s12  ;;  %s268_s19 = scalar_lea.vmem %s1762_s0, %s1106_s13 }
  0x18   : > { %v1326_v1 = vld [vmem:[%s275_s16] sm:$0xff]   ;;  %v1327_v2 = vld [vmem:[%s275_s16 + $0x8] sm:$0xff]   ;;  %v1328_v3 = vld [vmem:[%s275_s16 + $0x10] sm:$0xff]   ;;  %s1104_s11 = sshll.u32 %s261_s10, 5  ;;  %s1161_s13 = sshll.u32 %s1509_s25, 9 }
  0x19   : > { %1220 = vmatprep.mubr.msk.bf16.mxu0 %vm394_vm0, %v1326_v1  ;;  %v1549_v4 = vld [vmem:[%s268_s19] sm:$0xff]  ;;  %v1551_v5 = vld [vmem:[%s268_s19 + $0x8] sm:$0xff]  ;;  %v1329_v12 = vld [vmem:[%s275_s16 + $0x18] sm:$0xff]   ;;  %s263_s12 = scalar_lea.vmem [#allocation2], %s1104_s11  ;;  %s1715_s17 = scalar_lea.hbm %s1768_s6, %s1161_s13 }
  0x1a   : > { %1221 = vmatmul.mubr.msk.bf16.vlgmr.msra.gmra.mrb[0].mxu0 %vm394_vm0, %v1327_v2  ;;  %v281_v6 = vunpack.c.0.s8 %v1549_v4  ;;  %v283_v7 = vunpack.c.2.s8 %v1549_v4  ;;  %v282_v8 = vunpack.c.1.s8 %v1549_v4  ;;  %v284_v9 = vunpack.c.3.s8 %v1549_v4  ;;  %s1026_s14 = sshll.u32 %s263_s12, 4  ;;  %s1721_s25 = scalar_lea.sflag [#allocation3], %s261_s10  ;;  %s1717_s14 = int_to_ptr.vmem [resolvable:$true] %s1026_s14 }
  0x1b   : > { %1224 = vmatprep.mubr.msk.bf16.mxu0 %vm394_vm0, %v1328_v3  ;;  %v286_v10 = vunpack.c.1.s8 %v1551_v5  ;;  %v285_v11 = vunpack.c.0.s8 %v1551_v5  ;;  %v288_v19 = vunpack.c.3.s8 %v1551_v5  ;;  %v287_v20 = vunpack.c.2.s8 %v1551_v5  ;;  %1245 = vmatpush3.bf16.msra.mxu0 %v1330_v32  ;;  %v1336_v32 = vld [vmem:[%s1766_s4 + $0x30] sm:$0xff]   ;;  %s1386_s18 = scalar_lea.vmem %s1717_s14, 512  ;;  %s1450_s19 = smov [#allocation2]  }
  0x1c   : > { %v289_v13 = vcvt.s32.f32 %v281_v6  ;;  %v291_v14 = vcvt.s32.f32 %v283_v7  ;;  %v290_v15 = vcvt.s32.f32 %v282_v8  ;;  %v292_v16 = vcvt.s32.f32 %v284_v9  ;;  %1246 = vmatprep.subr.bf16.mxu0 %v1331_v33  ;;  %p1387_p11 = scmp.ne.s32.totalorder %s1717_s14, %s1386_s18  ;;  %s1390_s20 = sshll.u32 %s1450_s19, 4  ;;  %s1391_s20 = int_to_ptr.vmem [resolvable:$false] %s1390_s20 }
  0x1d   : > { %v294_v23 = vcvt.s32.f32 %v286_v10  ;;  %v293_v24 = vcvt.s32.f32 %v285_v11  ;;  %v296_v27 = vcvt.s32.f32 %v288_v19  ;;  %v295_v28 = vcvt.s32.f32 %v287_v20  ;;  %s1392_s26 = scalar_lea.vmem %s1391_s20, 1024  ;;  %p1393_p0 = scmp.lt.s32.totalorder %s1717_s14, %s1391_s20 }
  0x1e   : > { %v298_v17 = vsel %vm297_vm1, %v289_v13, 0.0  ;;  %v304_v18 = vsel %vm297_vm1, %v291_v14, 0.0  ;;  %v301_v21 = vsel %vm297_vm1, %v290_v15, 0.0  ;;  %v307_v22 = vsel %vm297_vm1, %v292_v16, 0.0  ;;  %p1388_p12 = pnand %p1387_p11, %p1526_p5  ;;  %p1394_p1 = scmp.lt.s32.totalorder %s1392_s26, %s1386_s18 }
  0x1f   : > { %299 = vadd.xlane.f32.xlu0 %v298_v17  ;;  %305 = vadd.xlane.f32.xlu1 %v304_v18  ;;  %v313_v25 = vsel %vm297_vm1, %v294_v23, 0.0  ;;  %v310_v26 = vsel %vm297_vm1, %v293_v24, 0.0  ;;  %v319_v29 = vsel %vm297_vm1, %v296_v27, 0.0  ;;  %v316_v30 = vsel %vm297_vm1, %v295_v28, 0.0 }
  0x20   : > { %v354_v31 = vunpack.c.l.s8.bf16 %v1549_v4  ;;  %1247 = vmatpush3.bf16.msra.mxu0 %v1331_v33  ;;  %v356_v27 = vunpack.c.l.s8.bf16 %v1551_v5  ;;  %v1337_v33 = vld [vmem:[%s1766_s4 + $0x38] sm:$0xff]   ;;  %p1389_p13 = pneg %p1388_p12  ;;  %p1395_p2 = por %p1394_p1, %p1393_p0 }
  0x21   : > { %1248 = vmatprep.subr.bf16.mxu0 %v1332_v34 }
  0x22   : > { %1225 = vmatmul.mubr.msk.bf16.gmra.mrb[4].mxu0 %vm394_vm0, %v1329_v12  ;;  %1232 = vmatprep.mubr.msk.bf16.mxu1 %vm297_vm1, %v354_v31  ;;  %p1396_p3 = pnand %p1395_p2, %p1389_p13 }
  0x23   : > { %302 = vadd.xlane.f32.xlu0 %v301_v21  ;;  %308 = vadd.xlane.f32.xlu1 %v307_v22 }
  0x24   : > { %1249 = vmatpush3.bf16.msra.mxu0 %v1332_v34 }
  0x25   : > { %1250 = vmatprep.subr.bf16.mxu0 %v1333_v35 }
  0x27   : > { %314 = vadd.xlane.f32.xlu1 %v313_v25  ;;  %311 = vadd.xlane.f32.xlu0 %v310_v26  ;;  %v355_v25 = vunpack.c.h.s8.bf16 %v1549_v4 }
  0x28   : > { %1251 = vmatpush3.bf16.msra.mxu0 %v1333_v35 }
  0x29   : > { %1252 = vmatprep.subr.bf16.mxu0 %v1334_v36 }
  0x2b   : > { %320 = vadd.xlane.f32.xlu1 %v319_v29  ;;  %317 = vadd.xlane.f32.xlu0 %v316_v30  ;;  %v357_v29 = vunpack.c.h.s8.bf16 %v1551_v5  ;;  %v1335_v30 = vld [vmem:[%s1766_s4 + $0x28] sm:$0xff]  }
  0x2c   : > { %1253 = vmatpush3.bf16.msra.mxu0 %v1334_v36 }
  0x2d   : > { %1254 = vmatprep.subr.bf16.mxu0 %v1335_v30 }
  0x30   : > { %1255 = vmatpush3.bf16.msra.mxu0 %v1335_v30 }
  0x31   : > { %1256 = vmatprep.subr.bf16.mxu0 %v1336_v32 }
  0x34   : > { %1257 = vmatpush3.bf16.msra.mxu0 %v1336_v32 }
  0x35   : > { %1258 = vmatprep.subr.bf16.mxu0 %v1337_v33 }
  0x38   : > { %1259 = vmatpush3.bf16.msra.mxu0 %v1337_v33 }
  0xac   : > { %v306_v37 = vpop.xlane.xlu1 %305  ;;  %v300_v38 = vpop.xlane.xlu0 %299 }
  0xad   : > { %v330_v41 = vmax.f32 %v300_v38, 1e-12  ;;  %v332_v43 = vmax.f32 %v306_v37, 1e-12  ;;  %vm324_vm2 = vcmp.gt.f32.partialorder %v306_v37, 0.0  ;;  %vm322_vm4 = vcmp.gt.f32.partialorder %v300_v38, 0.0 }
  0xaf   : > { %1338 = vrsqrt.f32 %v330_v41 }
  0xb0   : > { %v309_v39 = vpop.xlane.xlu1 %308  ;;  %v303_v40 = vpop.xlane.xlu0 %302  ;;  %1340 = vrsqrt.f32 %v332_v43 }
  0xb1   : > { %v333_v45 = vmax.f32 %v309_v39, 1e-12  ;;  %v331_v46 = vmax.f32 %v303_v40, 1e-12  ;;  %vm325_vm3 = vcmp.gt.f32.partialorder %v309_v39, 0.0  ;;  %vm323_vm5 = vcmp.gt.f32.partialorder %v303_v40, 0.0 }
  0xb3   : > { %1342 = vrsqrt.f32 %v333_v45 }
  0xb4   : > { %v315_v42 = vpop.xlane.xlu1 %314  ;;  %v312_v44 = vpop.xlane.xlu0 %311  ;;  %1344 = vrsqrt.f32 %v331_v46 }
  0xb5   : > { %v335_v49 = vmax.f32 %v315_v42, 1e-12  ;;  %v334_v52 = vmax.f32 %v312_v44, 1e-12  ;;  %vm327_vm8 = vcmp.gt.f32.partialorder %v315_v42, 0.0  ;;  %vm326_vm9 = vcmp.gt.f32.partialorder %v312_v44, 0.0 }
  0xb7   : > { %1346 = vrsqrt.f32 %v335_v49 }
  0xb8   : > { %v321_v47 = vpop.xlane.xlu1 %320  ;;  %v318_v48 = vpop.xlane.xlu0 %317 }
  0xb9   : > { %v337_v50 = vmax.f32 %v321_v47, 1e-12  ;;  %v336_v51 = vmax.f32 %v318_v48, 1e-12  ;;  %v1339_v53 = vpop.eup %1338  ;;  %vm329_vm6 = vcmp.gt.f32.partialorder %v321_v47, 0.0  ;;  %vm328_vm7 = vcmp.gt.f32.partialorder %v318_v48, 0.0 }
  0xba   : > { %v1341_v54 = vpop.eup %1340  ;;  %v1593_v62 = vsel %vm322_vm4, %v1339_v53, 0.0 }
  0xbb   : > { %1348 = vrsqrt.f32 %v337_v50  ;;  %v1589_v59 = vsel %vm324_vm2, %v1341_v54, 0.0 }
  0xbc   : > { %1350 = vrsqrt.f32 %v336_v51 }
  0xbd   : > { %1352 = vrsqrt.f32 %v334_v52  ;;  %v1343_v55 = vpop.eup %1342 }
  0xbe   : > { %v1345_v56 = vpop.eup %1344  ;;  %v1591_v60 = vsel %vm325_vm3, %v1343_v55, 0.0 }
  0xbf   : > { %v1595_v63 = vsel %vm323_vm5, %v1345_v56, 0.0 }
  0xc1   : > { %v1347_v7 = vpop.eup %1346 }
  0xc2   : > { %v1605_v18 = vsel %vm327_vm8, %v1347_v7, 0.0 }
  0xc5   : > { %v1349_v9 = vpop.eup %1348 }
  0xc6   : > { %v1351_v11 = vpop.eup %1350  ;;  %v1601_v15 = vsel %vm329_vm6, %v1349_v9, 0.0 }
  0xc7   : > { %v1353_v12 = vpop.eup %1352  ;;  %v1603_v16 = vsel %vm328_vm7, %v1351_v11, 0.0 }
  0xc8   : > { %v1607_v19 = vsel %vm326_vm9, %v1353_v12, 0.0 }
  0xed   : > { %v1222_v57 = vpop.f32.mrb[0].mxu0 }
  0xee   : > { %v441_v58 = vpop.f32.mrb[1].mxu0  ;;  %v474_v0 = vmul.f32 %v1222_v57, %v1589_v59 }
  0xef   : > { %v1223_v61 = vpop.f32.mrb[2].mxu0  ;;  %v472_v3 = vmul.f32 %v441_v58, %v1593_v62 }
  0xf0   : > { %v475_v1 = vmul.f32 %v1223_v61, %v1591_v60  ;;  %v444_v2 = vpop.f32.mrb[3].mxu0 }
  0xf1   : > { %v473_v6 = vmul.f32 %v444_v2, %v1595_v63 }
  0xf2   : > { %v481_v8 = vpack.c.bf16 %v475_v1, %v474_v0 }
  0xf3   : > { %v480_v10 = vpack.c.bf16 %v473_v6, %v472_v3 }
  0xf5   : > { %v1226_v13 = vpop.f32.mrb[4].mxu0  ;;  %1228 = vmatprep.subr.bf16.mxu1 %v480_v10 }
  0xf6   : > { %v457_v14 = vpop.f32.mrb[5].mxu0  ;;  %1229 = vmatpush3.bf16.msra.mxu1 %v480_v10  ;;  %v478_v20 = vmul.f32 %v1226_v13, %v1603_v16 }
  0xf7   : > { %v1227_v17 = vpop.f32.mrb[6].mxu0  ;;  %1230 = vmatprep.subr.bf16.mxu1 %v481_v8  ;;  %v476_v23 = vmul.f32 %v457_v14, %v1607_v19 }
  0xf8   : > { %v479_v21 = vmul.f32 %v1227_v17, %v1601_v15  ;;  %v460_v22 = vpop.f32.mrb[7].mxu0 }
  0xf9   : > { %v477_v24 = vmul.f32 %v460_v22, %v1605_v18 }
  0xfa   : > { %v483_v26 = vpack.c.bf16 %v479_v21, %v478_v20  ;;  %1231 = vmatpush3.bf16.msra.mxu1 %v481_v8 }
  0xfb   : > { %v482_v28 = vpack.c.bf16 %v477_v24, %v476_v23 }
  0xfd   : > { %1233 = vmatmul.mubr.msk.bf16.vlgmr.msra.gmra.mrb[0].mxu1 %vm297_vm1, %v355_v25  ;;  %1236 = vmatprep.subr.bf16.mxu1 %v482_v28 }
  0xfe   : > { %1237 = vmatpush3.bf16.msra.mxu1 %v482_v28  ;;  %1240 = vmatprep.mubr.msk.bf16.mxu1 %vm297_vm1, %v356_v27 }
  0xff   : > { %1238 = vmatprep.subr.bf16.mxu1 %v483_v26 }
 0x102   : > { %1239 = vmatpush3.bf16.msra.mxu1 %v483_v26 }
 0x105   : > { %1241 = vmatmul.mubr.msk.bf16.vlgmr.msra.gmra.mrb[4].mxu1 %vm297_vm1, %v357_v29 }
 0x106   : > { %1272 = vmatprep.mubr.msk.bf16.mxu1 %vm297_vm1, %v354_v31  ;;  %v1123_v31 = vld [vmem:[%s1765_s3] ss:$0 sm:$0xff] }
 0x1d0   : > { %v1234_v34 = vpop.f32.mrb[0].mxu1 }
 0x1d1   : > { %v596_v35 = vmul.f32 %v1234_v34, %v1589_v59  ;;  %v524_v36 = vpop.f32.mrb[1].mxu1 }
 0x1d2   : > { %v594_v37 = vmul.f32 %v524_v36, %v1593_v62  ;;  %v1235_v38 = vpop.f32.mrb[2].mxu1 }
 0x1d3   : > { %v611_v39 = vadd.f32 %v1123_v31, %v596_v35  ;;  %v597_v40 = vmul.f32 %v1235_v38, %v1591_v60  ;;  %v527_v41 = vpop.f32.mrb[3].mxu1 }
 0x1d4   : > { %v609_v42 = vadd.f32 %v1123_v31, %v594_v37  ;;  %v595_v43 = vmul.f32 %v527_v41, %v1595_v63 }
 0x1d5   : > { %v612_v44 = vadd.f32 %v1123_v31, %v597_v40  ;;  %v619_v46 = vmax.f32 %v611_v39, 0.0  ;;  %v1136_v40 = vld [vmem:[%s1767_s5] ss:$0 sm:$0xff] }
 0x1d6   : > { %v610_v45 = vadd.f32 %v1123_v31, %v595_v43  ;;  %v617_v48 = vmax.f32 %v609_v42, 0.0 }
 0x1d7   : > { %v620_v47 = vmax.f32 %v612_v44, 0.0 }
 0x1d8   : > { %v618_v49 = vmax.f32 %v610_v45, 0.0  ;;  %v1242_v50 = vpop.f32.mrb[4].mxu1 }
 0x1d9   : > { %v626_v51 = vpack.c.bf16 %v620_v47, %v619_v46  ;;  %v600_v52 = vmul.f32 %v1242_v50, %v1603_v16  ;;  %v579_v53 = vpop.f32.mrb[5].mxu1 }
 0x1da   : > { %v598_v54 = vmul.f32 %v579_v53, %v1607_v19  ;;  %v1243_v55 = vpop.f32.mrb[6].mxu1  ;;  %v625_v56 = vpack.c.bf16 %v618_v49, %v617_v48 }
 0x1db   : > { %v615_v57 = vadd.f32 %v1123_v31, %v600_v52  ;;  %v601_v58 = vmul.f32 %v1243_v55, %v1601_v15  ;;  %v582_v61 = vpop.f32.mrb[7].mxu1 }
 0x1dc   : > { %v613_v0 = vadd.f32 %v1123_v31, %v598_v54  ;;  %v599_v1 = vmul.f32 %v582_v61, %v1605_v18  ;;  %1260 = vmatprep.mubr.bf16.mxu0 %v625_v56 }
 0x1dd   : > { %v616_v2 = vadd.f32 %v1123_v31, %v601_v58  ;;  %1261 = vmatmul.mubr.bf16.vlgmr.msra.gmra.mrb[8].mxu0 %v626_v51  ;;  %v623_v6 = vmax.f32 %v615_v57, 0.0 }
 0x1de   : > { %v614_v3 = vadd.f32 %v1123_v31, %v599_v1  ;;  %v621_v8 = vmax.f32 %v613_v0, 0.0 }
 0x1df   : > { %v624_v7 = vmax.f32 %v616_v2, 0.0 }
 0x1e0   : > { %v622_v9 = vmax.f32 %v614_v3, 0.0 }
 0x1e1   : > { %v628_v10 = vpack.c.bf16 %v624_v7, %v623_v6 }
 0x1e2   : > { %v627_v11 = vpack.c.bf16 %v622_v9, %v621_v8 }
 0x1e4   : > { %1264 = vmatprep.mubr.bf16.mxu0 %v627_v11 }
 0x1e5   : > { %1265 = vmatmul.mubr.bf16.gmra.mrb[12].mxu0 %v628_v10 }
 0x2b0   : > { %v1262_v12 = vpop.f32.mrb[8].mxu0 }
 0x2b1   : > { %v727_v13 = vpop.f32.mrb[9].mxu0  ;;  %v760_v17 = vmul.f32 %v1262_v12, %v1589_v59 }
 0x2b2   : > { %v1263_v14 = vpop.f32.mrb[10].mxu0  ;;  %v758_v22 = vmul.f32 %v727_v13, %v1593_v62 }
 0x2b3   : > { %v761_v20 = vmul.f32 %v1263_v14, %v1591_v60  ;;  %v730_v21 = vpop.f32.mrb[11].mxu0 }
 0x2b4   : > { %v759_v23 = vmul.f32 %v730_v21, %v1595_v63 }
 0x2b5   : > { %v767_v24 = vpack.c.bf16 %v761_v20, %v760_v17 }
 0x2b6   : > { %v766_v26 = vpack.c.bf16 %v759_v23, %v758_v22 }
 0x2b8   : > { %v1266_v28 = vpop.f32.mrb[12].mxu0  ;;  %1268 = vmatprep.subr.bf16.mxu1 %v766_v26 }
 0x2b9   : > { %v743_v30 = vpop.f32.mrb[13].mxu0  ;;  %1269 = vmatpush3.bf16.msra.mxu1 %v766_v26  ;;  %v764_v33 = vmul.f32 %v1266_v28, %v1603_v16 }
 0x2ba   : > { %v1267_v32 = vpop.f32.mrb[14].mxu0  ;;  %1270 = vmatprep.subr.bf16.mxu1 %v767_v24  ;;  %v762_v35 = vmul.f32 %v743_v30, %v1607_v19 }
 0x2bb   : > { %v765_v34 = vmul.f32 %v1267_v32, %v1601_v15  ;;  %v746_v31 = vpop.f32.mrb[15].mxu0 }
 0x2bc   : > { %v763_v36 = vmul.f32 %v746_v31, %v1605_v18 }
 0x2bd   : > { %v769_v37 = vpack.c.bf16 %v765_v34, %v764_v33  ;;  %1271 = vmatpush3.bf16.msra.mxu1 %v767_v24 }
 0x2be   : > { %v768_v38 = vpack.c.bf16 %v763_v36, %v762_v35 }
 0x2c0   : > { %1273 = vmatmul.mubr.msk.bf16.vlgmr.msra.gmra.mrb[8].mxu1 %vm297_vm1, %v355_v25  ;;  %1276 = vmatprep.subr.bf16.mxu1 %v768_v38 }
 0x2c1   : > { %1277 = vmatpush3.bf16.msra.mxu1 %v768_v38  ;;  %1280 = vmatprep.mubr.msk.bf16.mxu1 %vm297_vm1, %v356_v27 }
 0x2c2   : > { %1278 = vmatprep.subr.bf16.mxu1 %v769_v37 }
 0x2c5   : > { %1279 = vmatpush3.bf16.msra.mxu1 %v769_v37 }
 0x2c8   : > { %1281 = vmatmul.mubr.msk.bf16.vlgmr.msra.gmra.mrb[12].mxu1 %vm297_vm1, %v357_v29 }
 0x393   : > { %v1274_v39 = vpop.f32.mrb[8].mxu1 }
 0x394   : > { %v870_v4 = vmul.f32 %v1274_v39, %v1589_v59  ;;  %v804_v25 = vpop.f32.mrb[9].mxu1 }
 0x395   : > { %v1275_v41 = vpop.f32.mrb[10].mxu1  ;;  %v868_v42 = vmul.f32 %v804_v25, %v1593_v62 }
 0x396   : > { %v871_v43 = vmul.f32 %v1275_v41, %v1591_v60  ;;  %v807_v27 = vpop.f32.mrb[11].mxu1  ;;  %v885_v44 = vadd.f32 %v1136_v40, %v870_v4 }
 0x397   : > { %v869_v45 = vmul.f32 %v807_v27, %v1595_v63  ;;  %v883_v29 = vadd.f32 %v1136_v40, %v868_v42 }
 0x398   : > { %895 = vmax.xlane.f32.xlu0 %v885_v44  ;;  %v886_v5 = vadd.f32 %v1136_v40, %v871_v43 }
 0x399   : > { %v884_v48 = vadd.f32 %v1136_v40, %v869_v45 }
 0x39a   : > { %897 = vmax.xlane.f32.xlu1 %v886_v5 }
 0x39b   : > { %v1282_v46 = vpop.f32.mrb[12].mxu1 }
 0x39c   : > { %891 = vmax.xlane.f32.xlu0 %v883_v29  ;;  %v853_v47 = vpop.f32.mrb[13].mxu1  ;;  %v874_v62 = vmul.f32 %v1282_v46, %v1603_v16 }
 0x39d   : > { %v872_v59 = vmul.f32 %v853_v47, %v1607_v19  ;;  %v1283_v49 = vpop.f32.mrb[14].mxu1 }
 0x39e   : > { %893 = vmax.xlane.f32.xlu1 %v884_v48  ;;  %v856_v50 = vpop.f32.mrb[15].mxu1  ;;  %v875_v63 = vmul.f32 %v1283_v49, %v1601_v15  ;;  %v889_v53 = vadd.f32 %v1136_v40, %v874_v62 }
 0x39f   : > { %v873_v60 = vmul.f32 %v856_v50, %v1605_v18  ;;  %v887_v51 = vadd.f32 %v1136_v40, %v872_v59 }
 0x3a0   : > { %v890_v54 = vadd.f32 %v1136_v40, %v875_v63 }
 0x3a1   : > { %899 = vmax.xlane.f32.xlu0 %v887_v51  ;;  %v888_v52 = vadd.f32 %v1136_v40, %v873_v60 }
 0x3a3   : > { %901 = vmax.xlane.f32.xlu1 %v888_v52 }
 0x3a5   : > { %903 = vmax.xlane.f32.xlu0 %v889_v53 }
 0x3a7   : > { %905 = vmax.xlane.f32.xlu1 %v890_v54 }
 0x425   : > { %v896_v55 = vpop.xlane.xlu0 %895 }
 0x426   : > { %v1676_v56 = vsub.f32 %v885_v44, %v896_v55 }
 0x427   : > { %v898_v19 = vpop.xlane.xlu1 %897 }
 0x428   : > { %v919_v57 = vmul.f32 1.442695, %v1676_v56  ;;  %v1679_v58 = vsub.f32 %v886_v5, %v898_v19 }
 0x429   : > { %v892_v16 = vpop.xlane.xlu0 %891 }
 0x42a   : > { %1354 = vpow2.f32 %v919_v57  ;;  %v921_v18 = vmul.f32 1.442695, %v1679_v58  ;;  %v1682_v15 = vsub.f32 %v883_v29, %v892_v16 }
 0x42b   : > { %v894_v61 = vpop.xlane.xlu1 %893 }
 0x42c   : > { %1356 = vpow2.f32 %v921_v18  ;;  %v915_v0 = vmul.f32 1.442695, %v1682_v15  ;;  %v1685_v1 = vsub.f32 %v884_v48, %v894_v61 }
 0x42e   : > { %1358 = vpow2.f32 %v915_v0  ;;  %v917_v2 = vmul.f32 1.442695, %v1685_v1  ;;  %v900_v3 = vpop.xlane.xlu0 %899 }
 0x42f   : > { %v1688_v6 = vsub.f32 %v887_v51, %v900_v3 }
 0x430   : > { %1360 = vpow2.f32 %v917_v2  ;;  %v902_v7 = vpop.xlane.xlu1 %901 }
 0x431   : > { %v923_v8 = vmul.f32 1.442695, %v1688_v6  ;;  %v1691_v9 = vsub.f32 %v888_v52, %v902_v7 }
 0x432   : > { %v904_v10 = vpop.xlane.xlu0 %903 }
 0x433   : > { %1362 = vpow2.f32 %v923_v8  ;;  %v925_v11 = vmul.f32 1.442695, %v1691_v9  ;;  %v1694_v12 = vsub.f32 %v889_v53, %v904_v10 }
 0x434   : > { %v1355_v13 = vpop.eup %1354  ;;  %v906_v14 = vpop.xlane.xlu1 %905 }
 0x435   : > { %1364 = vpow2.f32 %v925_v11  ;;  %v927_v17 = vmul.f32 1.442695, %v1694_v12  ;;  %v1697_v20 = vsub.f32 %v890_v54, %v906_v14  ;;  %935 = vadd.xlane.f32.xlu0 %v1355_v13 }
 0x436   : > { %v1357_v21 = vpop.eup %1356 }
 0x437   : > { %1366 = vpow2.f32 %v927_v17  ;;  %v929_v22 = vmul.f32 1.442695, %v1697_v20  ;;  %937 = vadd.xlane.f32.xlu1 %v1357_v21 }
 0x438   : > { %v1359_v23 = vpop.eup %1358 }
 0x439   : > { %1368 = vpow2.f32 %v929_v22  ;;  %931 = vadd.xlane.f32.xlu0 %v1359_v23 }
 0x43a   : > { %v1361_v24 = vpop.eup %1360 }
 0x43b   : > { %933 = vadd.xlane.f32.xlu1 %v1361_v24 }
 0x43d   : > { %v1363_v26 = vpop.eup %1362 }
 0x43e   : > { %939 = vadd.xlane.f32.xlu0 %v1363_v26 }
 0x43f   : > { %v1365_v28 = vpop.eup %1364 }
 0x440   : > { %941 = vadd.xlane.f32.xlu1 %v1365_v28 }
 0x441   : > { %v1367_v30 = vpop.eup %1366 }
 0x442   : > { %943 = vadd.xlane.f32.xlu0 %v1367_v30 }
 0x443   : > { %v1369_v32 = vpop.eup %1368 }
 0x444   : > { %945 = vadd.xlane.f32.xlu1 %v1369_v32 }
 0x4c2   : > { %v936_v33 = vpop.xlane.xlu0 %935 }
 0x4c3   : > { %1370 = vlog2.f32 %v936_v33 }
 0x4c4   : > { %v938_v34 = vpop.xlane.xlu1 %937 }
 0x4c5   : > { %1372 = vlog2.f32 %v938_v34 }
 0x4c6   : > { %v932_v31 = vpop.xlane.xlu0 %931 }
 0x4c7   : > { %1374 = vlog2.f32 %v932_v31 }
 0x4c8   : > { %v934_v35 = vpop.xlane.xlu1 %933 }
 0x4c9   : > { %1376 = vlog2.f32 %v934_v35 }
 0x4cb   : > { %v940_v36 = vpop.xlane.xlu0 %939 }
 0x4cc   : > { %1378 = vlog2.f32 %v940_v36 }
 0x4cd   : > { %v1371_v37 = vpop.eup %1370  ;;  %v942_v38 = vpop.xlane.xlu1 %941 }
 0x4ce   : > { %v952_v39 = vmul.f32 0.6931472, %v1371_v37  ;;  %1380 = vlog2.f32 %v942_v38 }
 0x4cf   : > { %v1373_v40 = vpop.eup %1372  ;;  %v944_v4 = vpop.xlane.xlu0 %943 }
 0x4d0   : > { %v954_v25 = vmul.f32 0.6931472, %v1373_v40  ;;  %1382 = vlog2.f32 %v944_v4  ;;  %v965_v43 = vsub.f32 %v1676_v56, %v952_v39 }
 0x4d1   : > { %v1375_v41 = vpop.eup %1374  ;;  %v946_v42 = vpop.xlane.xlu1 %945 }
 0x4d2   : > { %v966_v27 = vsub.f32 %v1679_v58, %v954_v25  ;;  %v948_v44 = vmul.f32 0.6931472, %v1375_v41  ;;  %1384 = vlog2.f32 %v946_v42 }
 0x4d3   : > { %v1377_v45 = vpop.eup %1376 }
 0x4d4   : > { %v1170_v5 = vpack.c.bf16 %v966_v27, %v965_v43  ;;  %v950_v29 = vmul.f32 0.6931472, %v1377_v45  ;;  %v963_v47 = vsub.f32 %v1682_v15, %v948_v44 }
 0x4d6   : > { %v1379_v46 = vpop.eup %1378  ;;  %1182 = vst [vmem:[%s263_s12 + $0x8] sm:$0xff] %v1170_v5   ;;  %v964_v48 = vsub.f32 %v1685_v1, %v950_v29 }
 0x4d7   : > { %v956_v59 = vmul.f32 0.6931472, %v1379_v46 }
 0x4d8   : > { %v1381_v49 = vpop.eup %1380  ;;  %v1165_v50 = vpack.c.bf16 %v964_v48, %v963_v47 }
 0x4d9   : > { %v958_v62 = vmul.f32 0.6931472, %v1381_v49  ;;  %v967_v51 = vsub.f32 %v1688_v6, %v956_v59 }
 0x4da   : > { %v1383_v60 = vpop.eup %1382  ;;  %1166 = vst [vmem:[%s263_s12] sm:$0xff] %v1165_v50  }
 0x4db   : > { %v968_v63 = vsub.f32 %v1691_v9, %v958_v62  ;;  %v960_v52 = vmul.f32 0.6931472, %v1383_v60 }
 0x4dc   : > { %v1385_v53 = vpop.eup %1384 }
 0x4dd   : > { %v1175_v54 = vpack.c.bf16 %v968_v63, %v967_v51  ;;  %v962_v55 = vmul.f32 0.6931472, %v1385_v53  ;;  %v969_v56 = vsub.f32 %v1694_v12, %v960_v52 }
 0x4df   : > { %1183 = vst [vmem:[%s263_s12 + $0x10] sm:$0xff] %v1175_v54   ;;  %v970_v19 = vsub.f32 %v1697_v20, %v962_v55 }
 0x4e1   : > { %v1180_v57 = vpack.c.bf16 %v970_v19, %v969_v56 }
 0x4e3   : > { %1184 = vst [vmem:[%s263_s12 + $0x18] sm:$0xff] %v1180_v57  }
 0x4e4   : > { %1399 = shalt.err (!%p1396_p3)
}
 0x4e5   : > { %s1400_s28 = scalar_lea.hbm %s1715_s17, 512  ;;  %s1404_s10 = scalar_lea.hbm %s1768_s6, 2048 }
 0x4e6   : > { %p1401_p4 = scmp.ne.s32.totalorder %s1715_s17, %s1400_s28  ;;  %p1405_p9 = scmp.lt.u32.totalorder %s1715_s17, %s1768_s6 }
 0x4e7   : > { %p1406_p10 = scmp.lt.u32.totalorder %s1404_s10, %s1400_s28  ;;  %p1408_p12 = scmp.lt.u32.totalorder %s1400_s28, %s1715_s17 }
 0x4e8   : > { %p1402_p7 = pnand %p1401_p4, %p1526_p5 }
 0x4e9   : > { %p1407_p11 = por %p1406_p10, %p1405_p9 }
 0x4ea   : > { %p1403_p8 = pneg %p1402_p7 }
 0x4eb   : > { %p1409_p13 = por %p1408_p12, %p1407_p11 }
 0x4ed   : > { %p1410_p0 = pnand %p1409_p13, %p1403_p8 }
 0x4ef   : > { %1413 = shalt.err (!%p1410_p0)
}
 0x4f0   : > { %s1451_s13 = smov 64   ;;  %s1452_s15 = smov 4  }
 0x4f1   : > { %1284 = dma.vmem_to_hbm [thread:$0]  (%p1526_p5), %s1717_s14, 512, %s1715_s17, %s1721_s25, %s1451_s13, %s1451_s13, %s1452_s15  }
 0x4f2 PF: > { %p1290_p1 = scmp.ge.s32.totalorder %s1448_s24, 2  ;;  %s1041_s16 = sand.u32 1, %s1436_s21  }
 0x4f3   : > { %s1042_s18 = scalar_lea.sflag [#allocation3], %s1041_s16 }
 0x4f4   : > { %p1287_p2 = pnand %p1290_p1, %p1530_p6 }
 0x4f6   : > { %1431 = dma.done.wait (!%p1287_p2), %s1042_s18, 512  }
 0x4f7   : > { %1433 = vsyncadd (!%p1287_p2), %s1042_s18, 4294966784  ;;  %p16_p3 = scmp.ge.s32.totalorder %s1513_s27, 6   ;;  %s1771_s21 = smov %s1440_s22 }
 0x4f8   : > { %s1772_s22 = smov %s1444_s23  ;;  %s1773_s23 = smov %s1524_s30 }
 0x4f9   : > { %s1774_s24 = smov %s1513_s27  ;;  %18 = sbr.rel (!%p16_p3) target bundleno = 3 (0x3), region = 82 }
 0x500   :  { %1047 = vsyncpa [#allocation3], 1 }
 0x501   :  { %1049 = vsyncpa [#allocation3 + $0x1], 1 }

</bundles_post_ra>
